<compile_context>
chip_gen: v7x
topology: tpu7x:2x2x1
jax: 0.10.0
libtpu: 0.0.40
codegen_flags: <defaults>
</compile_context>

<pallas_src>
import functools

import jax
import jax.numpy as jnp
from jax.experimental import pallas as pl
from jax.experimental.pallas import tpu as pltpu

LANES = 128
SUBLANES = 8
BASE = SUBLANES * LANES                 # 1024 elements = one f32 vreg tile
TARGET_BLOCK_BYTES = 4 * 1024 * 1024    # ~4 MiB per input block per step
VMEM_LIMIT_BYTES = 40 * 1024 * 1024     # explicit scoped-VMEM limit


def _num_tensorcores() -> int:
    """2 only on v7x (2 TensorCores/chip); v5e/v6e have a single TC."""
    try:
        kind = jax.devices()[0].device_kind.lower()
    except Exception:
        return 1
    return 2 if ("v7" in kind or "7x" in kind) else 1


def _linf_kernel(o_ref, t_ref, out_ref, acc_ref, *,
                 tile_rows, rows, tiles_per_core, needs_mask):
    c = pl.program_id(0)   # core axis (size 1 on single-TC chips)
    i = pl.program_id(1)   # reduction axis

    @pl.when(i == 0)
    def _():
        # |o - t| >= 0, so 0 is a safe identity for the running max.
        acc_ref[...] = jnp.zeros_like(acc_ref)

    # Compute in the input dtype (matches torch semantics; bf16 stays on the
    # bf16 VPU path on v6e/v7x); upcast to f32 only when merging into acc.
    a = jnp.abs(o_ref[...] - t_ref[...])

    def fold_into_acc(vals):
        # (tile_rows, 128) -> (8, 128) with pure VPU elementwise maxes
        # (no cross-lane work, no scalar/SMEM round trip).
        folded = jnp.max(
            vals.reshape(tile_rows // SUBLANES, SUBLANES, LANES), axis=0)
        acc_ref[...] = jnp.maximum(acc_ref[...], folded.astype(jnp.float32))

    if needs_mask:
        row_start = (c * tiles_per_core + i) * tile_rows
        is_interior = row_start + tile_rows <= rows

        @pl.when(is_interior)
        def _():
            fold_into_acc(a)   # fast path: no iota / compare / select

        @pl.when(jnp.logical_not(is_interior))
        def _():
            # Boundary / clamped ghost tile: zero rows past the true count.
            row_ids = row_start + jax.lax.broadcasted_iota(
                jnp.int32, (tile_rows, 1), 0)
            fold_into_acc(jnp.where(row_ids < rows, a, jnp.zeros_like(a)))
    else:
        fold_into_acc(a)

    @pl.when(i == pl.num_programs(1) - 1)
    def _():
        out_ref[0] = acc_ref[...]


def linf_loss(output, target):
    assert output.shape == target.shape, "output/target shapes must match"
    o_flat = jnp.ravel(output)
    t_flat = jnp.ravel(target)
    n = o_flat.shape[0]
    itemsize = jnp.dtype(o_flat.dtype).itemsize

    # Feed the kernel only the 1024-aligned prefix; the <1024-element tail is
    # reduced with plain jnp (avoids jnp.pad's full-array HBM copy for
    # misaligned sizes; the aligned case passes the arrays through untouched).
    rem_max = None
    n_main = (n // BASE) * BASE
    if n_main == 0:
        # Tiny input: pad to a single vreg tile (<= 1023 zeros, negligible).
        o_main = jnp.pad(o_flat, (0, BASE - n))
        t_main = jnp.pad(t_flat, (0, BASE - n))
        n_main = BASE
    elif n_main == n:
        o_main, t_main = o_flat, t_flat
    else:
        o_main, t_main = o_flat[:n_main], t_flat[:n_main]
        rem_max = jnp.max(jnp.abs(
            o_flat[n_main:].astype(jnp.float32)
            - t_flat[n_main:].astype(jnp.float32)))

    rows = n_main // LANES                                    # multiple of 8
    tile_rows_target = max(SUBLANES, TARGET_BLOCK_BYTES // (LANES * itemsize))
    tile_rows = min(tile_rows_target, rows)                   # multiple of 8
    tiles_total = pl.cdiv(rows, tile_rows)

    ncores = _num_tensorcores()
    if tiles_total < 2:
        ncores = 1
    tiles_per_core = pl.cdiv(tiles_total, ncores)
    needs_mask = (ncores * tiles_per_core * tile_rows) != rows

    o2d = o_main.reshape(rows, LANES)
    t2d = t_main.reshape(rows, LANES)

    def in_map(c, i):
        # Clamp out-of-range logical (ghost) tiles to a valid tile; the
        # in-kernel mask zeroes their contribution.
        return (jnp.minimum(c * tiles_per_core + i, tiles_total - 1), 0)

    kernel = functools.partial(
        _linf_kernel,
        tile_rows=tile_rows,
        rows=rows,
        tiles_per_core=tiles_per_core,
        needs_mask=needs_mask,
    )

    core_sem = pltpu.CORE_PARALLEL if ncores > 1 else pltpu.ARBITRARY

    out = pl.pallas_call(
        kernel,
        out_shape=jax.ShapeDtypeStruct((ncores, SUBLANES, LANES), jnp.float32),
        grid_spec=pltpu.PrefetchScalarGridSpec(
            num_scalar_prefetch=0,
            grid=(ncores, tiles_per_core),
            in_specs=[
                pl.BlockSpec((tile_rows, LANES), in_map),
                pl.BlockSpec((tile_rows, LANES), in_map),
            ],
            out_specs=pl.BlockSpec((1, SUBLANES, LANES), lambda c, i: (c, 0, 0)),
            scratch_shapes=[pltpu.VMEM((SUBLANES, LANES), jnp.float32)],
        ),
        compiler_params=pltpu.CompilerParams(
            dimension_semantics=(core_sem, pltpu.ARBITRARY),
            vmem_limit_bytes=VMEM_LIMIT_BYTES,
        ),
        cost_estimate=pl.CostEstimate(
            flops=3 * n_main, transcendentals=0,
            bytes_accessed=2 * n_main * itemsize),
    )(o2d, t2d)

    # Tiny final cross-lane reduce over (ncores, 8, 128) partial maxima.
    result = jnp.max(out)
    if rem_max is not None:
        result = jnp.maximum(result, rem_max)
    return result.astype(output.dtype)


if __name__ == "__main__":
    key = jax.random.PRNGKey(0)
    k1, k2 = jax.random.split(key)
    # Small NCHW-like shapes consistent with a typical loss input.
    output = jax.random.normal(k1, (2, 4, 16, 16), dtype=jnp.float32)
    target = jax.random.normal(k2, (2, 4, 16, 16), dtype=jnp.float32)

    loss = linf_loss(output, target)
    jax.block_until_ready(loss)

    ref = jnp.max(jnp.abs(output - target))
    assert jnp.allclose(loss, ref, rtol=1e-6, atol=1e-6), (loss, ref)
    print("KERNEL_OK")
</pallas_src>

<mosaic_0001>
module attributes {stable_mosaic.version = 11 : i64} {
  func.func @_linf_kernel(%arg0: i32, %arg1: i32, %arg2: memref<16x128xf32, #tpu.memory_space<vmem>>, %arg3: memref<16x128xf32, #tpu.memory_space<vmem>>, %arg4: memref<1x8x128xf32, #tpu.memory_space<vmem>>, %arg5: memref<8x128xf32, #tpu.memory_space<vmem>>) attributes {dimension_semantics = [#tpu.dimension_semantics<arbitrary>, #tpu.dimension_semantics<arbitrary>], iteration_bounds = array<i64: 1, 1>, scalar_prefetch = 0 : i64, scratch_operands = 1 : i64, tpu.core_type = #tpu.core_type<tc>, window_params = [{transform_indices = @transform_0, window_bounds = array<i64: 16, 128>}, {transform_indices = @transform_1, window_bounds = array<i64: 16, 128>}, {transform_indices = @transform_2, window_bounds = array<i64: 1, 8, 128>}]} {
    %c0_i32 = arith.constant 0 : i32
    %0 = arith.cmpi eq, %arg1, %c0_i32 : i32
    %1 = arith.extui %0 : i1 to i32
    %c0_i32_0 = arith.constant 0 : i32
    %2 = arith.cmpi ne, %1, %c0_i32_0 : i32
    scf.if %2 {
      %cst_10 = arith.constant 0.000000e+00 : f32
      %15 = vector.broadcast %cst_10 : f32 to vector<8x128xf32>
      %c0_11 = arith.constant 0 : index
      %c0_12 = arith.constant 0 : index
      %16 = vector.load %arg5[%c0_11, %c0_12] : memref<8x128xf32, #tpu.memory_space<vmem>>, vector<8x128xf32>
      tpu.vector_store %arg5[%c0_11, %c0_12], %15 {strides = array<i32>} : memref<8x128xf32, #tpu.memory_space<vmem>>, vector<8x128xf32>,
    } else {
    }
    %c0 = arith.constant 0 : index
    %c0_1 = arith.constant 0 : index
    %3 = vector.load %arg2[%c0, %c0_1] : memref<16x128xf32, #tpu.memory_space<vmem>>, vector<16x128xf32>
    %c0_2 = arith.constant 0 : index
    %c0_3 = arith.constant 0 : index
    %4 = vector.load %arg3[%c0_2, %c0_3] : memref<16x128xf32, #tpu.memory_space<vmem>>, vector<16x128xf32>
    %5 = arith.subf %3, %4 : vector<16x128xf32>
    %6 = math.absf %5 : vector<16x128xf32>
    %7 = vector.shape_cast %6 : vector<16x128xf32> to vector<2x8x128xf32>
    %cst = arith.constant dense<0xFF800000> : vector<8x128xf32>
    %8 = vector.multi_reduction <maximumf>, %7, %cst [0] : vector<2x8x128xf32> to vector<8x128xf32>
    %c0_4 = arith.constant 0 : index
    %c0_5 = arith.constant 0 : index
    %9 = vector.load %arg5[%c0_4, %c0_5] : memref<8x128xf32, #tpu.memory_space<vmem>>, vector<8x128xf32>
    %10 = arith.maximumf %9, %8 : vector<8x128xf32>
    %c0_6 = arith.constant 0 : index
    %c0_7 = arith.constant 0 : index
    %11 = vector.load %arg5[%c0_6, %c0_7] : memref<8x128xf32, #tpu.memory_space<vmem>>, vector<8x128xf32>
    tpu.vector_store %arg5[%c0_6, %c0_7], %10 {strides = array<i32>} : memref<8x128xf32, #tpu.memory_space<vmem>>, vector<8x128xf32>,
    %c0_i32_8 = arith.constant 0 : i32
    %12 = arith.cmpi eq, %arg1, %c0_i32_8 : i32
    %13 = arith.extui %12 : i1 to i32
    %c0_i32_9 = arith.constant 0 : i32
    %14 = arith.cmpi ne, %13, %c0_i32_9 : i32
    scf.if %14 {
      %c0_10 = arith.constant 0 : index
      %c0_11 = arith.constant 0 : index
      %15 = vector.load %arg5[%c0_10, %c0_11] : memref<8x128xf32, #tpu.memory_space<vmem>>, vector<8x128xf32>
      %c0_12 = arith.constant 0 : index
      %c0_13 = arith.constant 0 : index
      %c0_14 = arith.constant 0 : index
      %16 = vector.load %arg4[%c0_12, %c0_13, %c0_14] : memref<1x8x128xf32, #tpu.memory_space<vmem>>, vector<1x8x128xf32>
      %17 = vector.shape_cast %16 : vector<1x8x128xf32> to vector<8x128xf32>
      %18 = vector.shape_cast %15 : vector<8x128xf32> to vector<1x8x128xf32>
      tpu.vector_store %arg4[%c0_12, %c0_13, %c0_14], %18 {strides = array<i32>} : memref<1x8x128xf32, #tpu.memory_space<vmem>>, vector<1x8x128xf32>,
    } else {
    }
    return
  }
  func.func @transform_0(%arg0: i32, %arg1: i32) -> (i32, i32) {
    %c1_i32 = arith.constant 1 : i32
    %0 = arith.muli %arg0, %c1_i32 : i32
    %1 = arith.addi %0, %arg1 : i32
    %c0_i32 = arith.constant 0 : i32
    %2 = arith.minsi %1, %c0_i32 : i32
    %c0_i32_0 = arith.constant 0 : i32
    %c0_i32_1 = arith.constant 0 : i32
    return %2, %c0_i32_0 : i32, i32
  }
  func.func @transform_1(%arg0: i32, %arg1: i32) -> (i32, i32) {
    %c1_i32 = arith.constant 1 : i32
    %0 = arith.muli %arg0, %c1_i32 : i32
    %1 = arith.addi %0, %arg1 : i32
    %c0_i32 = arith.constant 0 : i32
    %2 = arith.minsi %1, %c0_i32 : i32
    %c0_i32_0 = arith.constant 0 : i32
    %c0_i32_1 = arith.constant 0 : i32
    return %2, %c0_i32_0 : i32, i32
  }
  func.func @transform_2(%arg0: i32, %arg1: i32) -> (i32, i32, i32) {
    %c0_i32 = arith.constant 0 : i32
    %c0_i32_0 = arith.constant 0 : i32
    %c0_i32_1 = arith.constant 0 : i32
    return %arg0, %c0_i32, %c0_i32_0 : i32, i32, i32
  }
}

</mosaic_0001>

<bundles_post_ra>
// kernel: tpu_custom_call.1
= control target key start
LH: loop header
LB: loop body
LE: loop exit
PB: predicated region body
PF: predicated region fallthrough
CT: control target
= control target key end

     0   :  { %7 = vsyncpa [#allocation4], 0  ;;  %s235_s0 = inlined_call_operand.hbm [shape: f32[16,128], index: 0, kind: input, shape index: {}]   ;;  %s236_s1 = inlined_call_operand.hbm [shape: f32[16,128], index: 1, kind: input, shape index: {}]   ;;  %s237_s2 = inlined_call_operand.hbm [shape: f32[1,8,128], index: 2, kind: output, shape index: {}]  }
   0x1   :  { %8 = vsyncpa [#allocation7], 0 }
   0x2   :  { %9 = vsyncpa [#allocation5], 0  ;;  %s179_s9 = smov [#allocation3]   ;;  %s107_s13 = scalar_lea.hbm %s235_s0, 256 }
   0x3   :  { %s21_s10 = sshll.u32 %s179_s9, 4  ;;  %p108_p0 = scmp.ne.s32.totalorder %s235_s0, %s107_s13  ;;  %s22_s10 = int_to_ptr.vmem [resolvable:$true] %s21_s10 }
   0x4   :  { %p111_p1 = scmp.lt.u32.totalorder %s107_s13, %s235_s0 }
   0x6   :  { %p113_p2 = pnand %p111_p1, %p108_p0 }
   0x8   :  { %116 = shalt.err (!%p113_p2)
}
   0x9   :  { %s117_s18 = scalar_lea.vmem %s22_s10, 256  ;;  %p122_p4 = scmp.lt.s32.totalorder %s22_s10, %s22_s10 }
   0xa   :  { %p118_p3 = scmp.ne.s32.totalorder %s22_s10, %s117_s18  ;;  %p123_p5 = scmp.lt.s32.totalorder %s117_s18, %s117_s18 }
   0xc   :  { %p124_p6 = por %p123_p5, %p122_p4 }
   0xe   :  { %p125_p7 = pnand %p124_p6, %p118_p3 }
  0x10   :  { %128 = shalt.err (!%p125_p7)
}
  0x11   :  { %s180_s19 = smov 128   ;;  %s181_s20 = smov 8  }
  0x12   :  { %27 = dma.hbm_to_vmem [thread:$0]  %s235_s0, 256, %s22_s10, [#allocation4], %s180_s19, %s180_s19, %s181_s20  }
  0x13   :  { %s182_s23 = smov [#allocation6]   ;;  %s129_s27 = scalar_lea.hbm %s236_s1, 256 }
  0x14   :  { %s39_s24 = sshll.u32 %s182_s23, 4  ;;  %p130_p8 = scmp.ne.s32.totalorder %s236_s1, %s129_s27  ;;  %s40_s24 = int_to_ptr.vmem [resolvable:$true] %s39_s24 }
  0x15   :  { %p133_p9 = scmp.lt.u32.totalorder %s129_s27, %s236_s1 }
  0x17   :  { %p135_p10 = pnand %p133_p9, %p130_p8 }
  0x19   :  { %138 = shalt.err (!%p135_p10)
}
  0x1a   :  { %s139_s4 = scalar_lea.vmem %s40_s24, 256  ;;  %p144_p12 = scmp.lt.s32.totalorder %s40_s24, %s40_s24 }
  0x1b   :  { %p140_p11 = scmp.ne.s32.totalorder %s40_s24, %s139_s4  ;;  %p145_p13 = scmp.lt.s32.totalorder %s139_s4, %s139_s4 }
  0x1d   :  { %p146_p0 = por %p145_p13, %p144_p12 }
  0x1f   :  { %p147_p1 = pnand %p146_p0, %p140_p11 }
  0x21   :  { %150 = shalt.err (!%p147_p1)
}
  0x22   :  { %45 = dma.hbm_to_vmem [thread:$0]  %s236_s1, 256, %s40_s24, [#allocation7], %s180_s19, %s180_s19, %s181_s20  }
  0x23   :  { %173 = dma.done.wait [#allocation4], 256  }
  0x24   :  { %174 = vsyncadd [#allocation4], 4294967040 }
  0x25   :  { %175 = dma.done.wait [#allocation7], 256  }
  0x26   :  { %176 = vsyncadd [#allocation7], 4294967040  ;;  %v65_v0 = vld [vmem:[#allocation3] sm:$0xff]  ;;  %v66_v1 = vld [vmem:[#allocation3 + $0x8] sm:$0xff]  ;;  %s183_s6 = smov [#allocation8]  }
  0x27   :  { %v67_v2 = vld [vmem:[#allocation6] sm:$0xff]  ;;  %v68_v3 = vld [vmem:[#allocation6 + $0x8] sm:$0xff]  ;;  %s88_s7 = sshll.u32 %s183_s6, 4  ;;  %s89_s7 = int_to_ptr.vmem [resolvable:$true] %s88_s7 }
  0x28   :  { %v69_v4 = vsub.f32 %v65_v0, %v67_v2  ;;  %v70_v5 = vsub.f32 %v66_v1, %v68_v3  ;;  %s151_s8 = scalar_lea.vmem %s89_s7, 128  ;;  %p156_p3 = scmp.lt.s32.totalorder %s89_s7, %s89_s7 }
  0x29   :  { %p152_p2 = scmp.ne.s32.totalorder %s89_s7, %s151_s8  ;;  %p157_p4 = scmp.lt.s32.totalorder %s151_s8, %s151_s8 }
  0x2a   :  { %v71_v6 = vand.u32 2147483647, %v69_v4  ;;  %v72_v7 = vand.u32 2147483647, %v70_v5 }
  0x2b   :  { %p158_p5 = por %p157_p4, %p156_p3 }
  0x2c   :  { %v73_v8 = vmax.f32.f32 %v71_v6, %v72_v7 }
  0x2d   :  { %p159_p6 = pnand %p158_p5, %p152_p2 }
  0x2e   :  { %v75_v9 = vmax.f32 %v73_v8, 0.0 }
  0x30   :  { %81 = vst [vmem:[#allocation8] sm:$0xff] %v75_v9 }
  0x31   :  { %162 = shalt.err (!%p159_p6)
}
  0x32   :  { %s163_s10 = scalar_lea.hbm %s237_s2, 128 }
  0x33   :  { %p164_p7 = scmp.ne.s32.totalorder %s237_s2, %s163_s10  ;;  %p167_p8 = scmp.lt.u32.totalorder %s163_s10, %s237_s2 }
  0x35   :  { %p169_p9 = pnand %p167_p8, %p164_p7 }
  0x37   :  { %172 = shalt.err (!%p169_p9)
}
  0x38   :  { %91 = dma.vmem_to_hbm [thread:$0]  %s89_s7, 128, %s237_s2, [#allocation5]  }
  0x39   :  { %177 = dma.done.wait [#allocation5], 128  }
  0x3a   :  { %178 = vsyncadd [#allocation5], 4294967168 }
  0x3b   :  { %95 = vsyncpa [#allocation4], 1 }
  0x3c   :  { %96 = vsyncpa [#allocation7], 1 }
  0x3d   :  { %97 = vsyncpa [#allocation5], 1 }

</bundles_post_ra>
